<compile_context>
chip_gen: v6e
topology: v6e:2x2x1
jax: 0.10.0
libtpu: 0.0.40
codegen_flags: <defaults>
</compile_context>

<pallas_src>
import functools
import jax
import jax.numpy as jnp
from jax.experimental import pallas as pl
from jax.experimental.pallas import tpu as pltpu

# ----------------------------- configuration --------------------------------
INPUT_KEYS = ["x", "y"]               # PlotterNode.inputs
OUTPUT_KEYS = ["u", "v", "rho", "T"]  # fixed in PlotterNode.__init__
D_IN = len(INPUT_KEYS)                # 2
D_OUT = len(OUTPUT_KEYS)              # 4
HIDDEN = 32                           # MLP hidden width (synthetic network)
N_POINTS = 256                        # points per region
N_REGIONS = 2                         # number of geometry regions
N_TOTAL = N_REGIONS * N_POINTS        # 512 -> multiple of 128 (lane-dense)


# ------------------------------ Pallas kernel --------------------------------
def _mlp_kernel(xT_ref, w1_ref, b1_ref, w2_ref, b2_ref, w3_ref, b3_ref,
                out_ref):
    """Fused 3-layer MLP (SiLU) over ALL regions' points in one shot.

    Layout: activations are (feature, point) so the point axis (512) maps to
    TPU lanes.  Output slab rows = [u, v, rho, T, x, y] so the coordinate
    pass-through is fused into the same lane-dense store.
    """
    xT = xT_ref[...]                                         # (D_IN, N)

    h = jnp.dot(w1_ref[...], xT,
                preferred_element_type=jnp.float32) + b1_ref[...]
    h = h * jax.nn.sigmoid(h)                                # SiLU, (HIDDEN, N)

    h = jnp.dot(w2_ref[...], h,
                preferred_element_type=jnp.float32) + b2_ref[...]
    h = h * jax.nn.sigmoid(h)                                # SiLU, (HIDDEN, N)

    y = jnp.dot(w3_ref[...], h,
                preferred_element_type=jnp.float32) + b3_ref[...]  # (D_OUT, N)

    # Single full-block, lane-dense store: outputs + input pass-through.
    out_ref[...] = jnp.concatenate([y, xT], axis=0).astype(out_ref.dtype)


@functools.partial(jax.jit, static_argnames=("n_total",))
def _run_network(coords_t, w1t, b1c, w2t, b2c, w3t, b3c, *, n_total):
    """coords_t: (D_IN, n_total) -> slab (D_OUT + D_IN, n_total)."""
    return pl.pallas_call(
        _mlp_kernel,
        out_shape=jax.ShapeDtypeStruct((D_OUT + D_IN, n_total), jnp.float32),
        grid_spec=pltpu.PrefetchScalarGridSpec(
            num_scalar_prefetch=0,
            grid=(1,),  # single fused block: whole problem fits VMEM easily
            in_specs=[
                pl.BlockSpec((D_IN, n_total), lambda i: (0, 0)),
                pl.BlockSpec((HIDDEN, D_IN), lambda i: (0, 0)),
                pl.BlockSpec((HIDDEN, 1), lambda i: (0, 0)),
                pl.BlockSpec((HIDDEN, HIDDEN), lambda i: (0, 0)),
                pl.BlockSpec((HIDDEN, 1), lambda i: (0, 0)),
                pl.BlockSpec((D_OUT, HIDDEN), lambda i: (0, 0)),
                pl.BlockSpec((D_OUT, 1), lambda i: (0, 0)),
            ],
            out_specs=pl.BlockSpec((D_OUT + D_IN, n_total), lambda i: (0, 0)),
        ),
        compiler_params=pltpu.CompilerParams(
            dimension_semantics=("arbitrary",)),
    )(coords_t, w1t, b1c, w2t, b2c, w3t, b3c)


# ------------------------------ module wrapper --------------------------------
class PlotterNodePallas:
    """Mirrors PlotterNode.forward: evaluates the network on the region point
    clouds, concatenates outputs across regions, passes inputs through."""

    def __init__(self, region_coords, params):
        # region_coords: list (len R) of dicts {'x': (N,1), 'y': (N,1)}
        self.region_coords = region_coords
        self.n_regions = len(region_coords)
        w1, b1, w2, b2, w3, b3 = params
        # Pre-transpose once so the kernel computes in (feature, point) layout.
        self.params_t = (
            w1.T,                     # (HIDDEN, D_IN)
            b1.reshape(HIDDEN, 1),    # bias columns broadcast across lanes
            w2.T,                     # (HIDDEN, HIDDEN)
            b2.reshape(HIDDEN, 1),
            w3.T,                     # (D_OUT, HIDDEN)
            b3.reshape(D_OUT, 1),
        )

    def forward(self):
        out_vars = {k: None for k in OUTPUT_KEYS}
        for k in INPUT_KEYS:
            out_vars[k] = None

        # Pack all regions: (R*N, D_IN) then transpose -> (D_IN, R*N) so the
        # point axis sits on TPU lanes inside the kernel.
        coords = jnp.concatenate([
            jnp.concatenate([self.region_coords[i][k] for k in INPUT_KEYS],
                            axis=-1)
            for i in range(self.n_regions)
        ], axis=0)                                    # (R*N, D_IN)
        n_total = coords.shape[0]
        coords_t = coords.T                           # (D_IN, R*N)

        slab = _run_network(coords_t, *self.params_t, n_total=n_total)

        # slab rows: [u, v, rho, T, x, y]; slice back to (M, 1) columns.
        for j, key in enumerate(OUTPUT_KEYS):
            out_vars[key] = slab[j].reshape(-1, 1)
        for j, key in enumerate(INPUT_KEYS):
            out_vars[key] = slab[D_OUT + j].reshape(-1, 1)
        return out_vars


# --------------------------------- main ---------------------------------------
def _init_params(key):
    k1, k2, k3 = jax.random.split(key, 3)

    def glorot(k, shape):
        fan_in, fan_out = shape
        s = jnp.sqrt(6.0 / (fan_in + fan_out))
        return jax.random.uniform(k, shape, jnp.float32, -s, s)

    w1 = glorot(k1, (D_IN, HIDDEN));   b1 = jnp.zeros((1, HIDDEN), jnp.float32)
    w2 = glorot(k2, (HIDDEN, HIDDEN)); b2 = jnp.zeros((1, HIDDEN), jnp.float32)
    w3 = glorot(k3, (HIDDEN, D_OUT));  b3 = jnp.zeros((1, D_OUT), jnp.float32)
    return (w1, b1, w2, b2, w3, b3)


if __name__ == "__main__":
    key = jax.random.PRNGKey(0)
    kp, kc = jax.random.split(key)
    params = _init_params(kp)

    # Synthetic per-region point clouds (what geo.x / geo.y would hold).
    region_coords = []
    for i in range(N_REGIONS):
        kc, kx, ky = jax.random.split(kc, 3)
        region_coords.append({
            "x": jax.random.uniform(kx, (N_POINTS, 1), jnp.float32),
            "y": jax.random.uniform(ky, (N_POINTS, 1), jnp.float32),
        })

    node = PlotterNodePallas(region_coords, params)
    out_vars = node.forward()
    jax.block_until_ready(out_vars)

    # Sanity check against a pure-JAX reference of the MLP + pass-through.
    w1, b1, w2, b2, w3, b3 = params
    coords_ref = jnp.concatenate([
        jnp.concatenate([region_coords[i][k] for k in INPUT_KEYS], axis=-1)
        for i in range(N_REGIONS)], axis=0)            # (R*N, D_IN)
    h = coords_ref @ w1 + b1; h = h * jax.nn.sigmoid(h)
    h = h @ w2 + b2;          h = h * jax.nn.sigmoid(h)
    ref = h @ w3 + b3                                  # (R*N, D_OUT)

    got = jnp.concatenate([out_vars[k] for k in OUTPUT_KEYS], axis=-1)
    assert got.shape == (N_TOTAL, D_OUT)
    assert jnp.allclose(got, ref, atol=1e-5, rtol=1e-5)
    got_in = jnp.concatenate([out_vars[k] for k in INPUT_KEYS], axis=-1)
    assert got_in.shape == (N_TOTAL, D_IN)
    assert jnp.allclose(got_in, coords_ref, atol=1e-6, rtol=1e-6)

    print("KERNEL_OK")
</pallas_src>

<mosaic_0001>
module attributes {stable_mosaic.version = 11 : i64} {
  func.func @_mlp_kernel(%arg0: i32, %arg1: memref<2x512xf32, #tpu.memory_space<vmem>>, %arg2: memref<32x2xf32, #tpu.memory_space<vmem>>, %arg3: memref<32x1xf32, #tpu.memory_space<vmem>>, %arg4: memref<32x32xf32, #tpu.memory_space<vmem>>, %arg5: memref<32x1xf32, #tpu.memory_space<vmem>>, %arg6: memref<4x32xf32, #tpu.memory_space<vmem>>, %arg7: memref<4x1xf32, #tpu.memory_space<vmem>>, %arg8: memref<6x512xf32, #tpu.memory_space<vmem>>) attributes {dimension_semantics = [#tpu.dimension_semantics<arbitrary>], iteration_bounds = array<i64: 1>, scalar_prefetch = 0 : i64, scratch_operands = 0 : i64, tpu.core_type = #tpu.core_type<tc>, window_params = [{pipeline_mode = #tpu.pipeline_mode<synchronous>, transform_indices = @transform_0, window_bounds = array<i64: 2, 512>}, {pipeline_mode = #tpu.pipeline_mode<synchronous>, transform_indices = @transform_1, window_bounds = array<i64: 32, 2>}, {pipeline_mode = #tpu.pipeline_mode<synchronous>, transform_indices = @transform_2, window_bounds = array<i64: 32, 1>}, {pipeline_mode = #tpu.pipeline_mode<synchronous>, transform_indices = @transform_3, window_bounds = array<i64: 32, 32>}, {pipeline_mode = #tpu.pipeline_mode<synchronous>, transform_indices = @transform_4, window_bounds = array<i64: 32, 1>}, {pipeline_mode = #tpu.pipeline_mode<synchronous>, transform_indices = @transform_5, window_bounds = array<i64: 4, 32>}, {pipeline_mode = #tpu.pipeline_mode<synchronous>, transform_indices = @transform_6, window_bounds = array<i64: 4, 1>}, {pipeline_mode = #tpu.pipeline_mode<synchronous>, transform_indices = @transform_7, window_bounds = array<i64: 6, 512>}]} {
    %c0 = arith.constant 0 : index
    %c0_0 = arith.constant 0 : index
    %0 = vector.load %arg1[%c0, %c0_0] : memref<2x512xf32, #tpu.memory_space<vmem>>, vector<2x512xf32>
    %c0_1 = arith.constant 0 : index
    %c0_2 = arith.constant 0 : index
    %1 = vector.load %arg2[%c0_1, %c0_2] : memref<32x2xf32, #tpu.memory_space<vmem>>, vector<32x2xf32>
    %cst = arith.constant dense<0.000000e+00> : vector<32x512xf32>
    %2 = tpu.matmul %1, %0, %cst {dimension_numbers = #tpu.dot_dimension_numbers<[1], [0], [0], [1], [0, 0, 1, 1], [], []>} : vector<32x2xf32>, vector<2x512xf32>, vector<32x512xf32> -> vector<32x512xf32>
    %c0_3 = arith.constant 0 : index
    %c0_4 = arith.constant 0 : index
    %3 = vector.load %arg3[%c0_3, %c0_4] : memref<32x1xf32, #tpu.memory_space<vmem>>, vector<32x1xf32>
    %4 = vector.broadcast %3 : vector<32x1xf32> to vector<32x512xf32>
    %5 = arith.addf %2, %4 : vector<32x512xf32>
    %6 = arith.negf %5 : vector<32x512xf32>
    %7 = math.exp %6 : vector<32x512xf32>
    %cst_5 = arith.constant 1.000000e+00 : f32
    %8 = vector.broadcast %cst_5 : f32 to vector<32x512xf32>
    %9 = arith.addf %8, %7 : vector<32x512xf32>
    %10 = arith.divf %8, %9 : vector<32x512xf32>
    %11 = arith.mulf %5, %10 : vector<32x512xf32>
    %c0_6 = arith.constant 0 : index
    %c0_7 = arith.constant 0 : index
    %12 = vector.load %arg4[%c0_6, %c0_7] : memref<32x32xf32, #tpu.memory_space<vmem>>, vector<32x32xf32>
    %cst_8 = arith.constant dense<0.000000e+00> : vector<32x512xf32>
    %13 = tpu.matmul %12, %11, %cst_8 {dimension_numbers = #tpu.dot_dimension_numbers<[1], [0], [0], [1], [0, 0, 1, 1], [], []>} : vector<32x32xf32>, vector<32x512xf32>, vector<32x512xf32> -> vector<32x512xf32>
    %c0_9 = arith.constant 0 : index
    %c0_10 = arith.constant 0 : index
    %14 = vector.load %arg5[%c0_9, %c0_10] : memref<32x1xf32, #tpu.memory_space<vmem>>, vector<32x1xf32>
    %15 = vector.broadcast %14 : vector<32x1xf32> to vector<32x512xf32>
    %16 = arith.addf %13, %15 : vector<32x512xf32>
    %17 = arith.negf %16 : vector<32x512xf32>
    %18 = math.exp %17 : vector<32x512xf32>
    %cst_11 = arith.constant 1.000000e+00 : f32
    %19 = vector.broadcast %cst_11 : f32 to vector<32x512xf32>
    %20 = arith.addf %19, %18 : vector<32x512xf32>
    %21 = arith.divf %19, %20 : vector<32x512xf32>
    %22 = arith.mulf %16, %21 : vector<32x512xf32>
    %c0_12 = arith.constant 0 : index
    %c0_13 = arith.constant 0 : index
    %23 = vector.load %arg6[%c0_12, %c0_13] : memref<4x32xf32, #tpu.memory_space<vmem>>, vector<4x32xf32>
    %cst_14 = arith.constant dense<0.000000e+00> : vector<4x512xf32>
    %24 = tpu.matmul %23, %22, %cst_14 {dimension_numbers = #tpu.dot_dimension_numbers<[1], [0], [0], [1], [0, 0, 1, 1], [], []>} : vector<4x32xf32>, vector<32x512xf32>, vector<4x512xf32> -> vector<4x512xf32>
    %c0_15 = arith.constant 0 : index
    %c0_16 = arith.constant 0 : index
    %25 = vector.load %arg7[%c0_15, %c0_16] : memref<4x1xf32, #tpu.memory_space<vmem>>, vector<4x1xf32>
    %26 = vector.broadcast %25 : vector<4x1xf32> to vector<4x512xf32>
    %27 = arith.addf %24, %26 : vector<4x512xf32>
    %28 = tpu.concatenate %27, %0 in 0 : vector<4x512xf32>, vector<2x512xf32> -> vector<6x512xf32>
    %c0_17 = arith.constant 0 : index
    %c0_18 = arith.constant 0 : index
    %29 = vector.load %arg8[%c0_17, %c0_18] : memref<6x512xf32, #tpu.memory_space<vmem>>, vector<6x512xf32>
    tpu.vector_store %arg8[%c0_17, %c0_18], %28 {strides = array<i32>} : memref<6x512xf32, #tpu.memory_space<vmem>>, vector<6x512xf32>,
    return
  }
  func.func @transform_0(%arg0: i32) -> (i32, i32) {
    %c0_i32 = arith.constant 0 : i32
    %c0_i32_0 = arith.constant 0 : i32
    %c0_i32_1 = arith.constant 0 : i32
    return %c0_i32, %c0_i32_0 : i32, i32
  }
  func.func @transform_1(%arg0: i32) -> (i32, i32) {
    %c0_i32 = arith.constant 0 : i32
    %c0_i32_0 = arith.constant 0 : i32
    %c0_i32_1 = arith.constant 0 : i32
    return %c0_i32, %c0_i32_0 : i32, i32
  }
  func.func @transform_2(%arg0: i32) -> (i32, i32) {
    %c0_i32 = arith.constant 0 : i32
    %c0_i32_0 = arith.constant 0 : i32
    %c0_i32_1 = arith.constant 0 : i32
    return %c0_i32, %c0_i32_0 : i32, i32
  }
  func.func @transform_3(%arg0: i32) -> (i32, i32) {
    %c0_i32 = arith.constant 0 : i32
    %c0_i32_0 = arith.constant 0 : i32
    %c0_i32_1 = arith.constant 0 : i32
    return %c0_i32, %c0_i32_0 : i32, i32
  }
  func.func @transform_4(%arg0: i32) -> (i32, i32) {
    %c0_i32 = arith.constant 0 : i32
    %c0_i32_0 = arith.constant 0 : i32
    %c0_i32_1 = arith.constant 0 : i32
    return %c0_i32, %c0_i32_0 : i32, i32
  }
  func.func @transform_5(%arg0: i32) -> (i32, i32) {
    %c0_i32 = arith.constant 0 : i32
    %c0_i32_0 = arith.constant 0 : i32
    %c0_i32_1 = arith.constant 0 : i32
    return %c0_i32, %c0_i32_0 : i32, i32
  }
  func.func @transform_6(%arg0: i32) -> (i32, i32) {
    %c0_i32 = arith.constant 0 : i32
    %c0_i32_0 = arith.constant 0 : i32
    %c0_i32_1 = arith.constant 0 : i32
    return %c0_i32, %c0_i32_0 : i32, i32
  }
  func.func @transform_7(%arg0: i32) -> (i32, i32) {
    %c0_i32 = arith.constant 0 : i32
    %c0_i32_0 = arith.constant 0 : i32
    %c0_i32_1 = arith.constant 0 : i32
    return %c0_i32, %c0_i32_0 : i32, i32
  }
}

</mosaic_0001>

<bundles_post_ra>
// kernel: _run_network.1
= control target key start
LH: loop header
LB: loop body
LE: loop exit
PB: predicated region body
PF: predicated region fallthrough
CT: control target
= control target key end

     0   :  { %v61_v1 = vlaneseq  ;;  %v1109_v2 = vmov 1983009808   ;;  %v1110_v4 = vmov 0.0   ;;  %v1111_v6 = vmov 0   ;;  %s1397_s0 = inlined_call_operand.vmem [shape: f32[2,512], index: 0, kind: input, shape index: {}]   ;;  %s1398_s1 = inlined_call_operand.vmem [shape: f32[32,2], index: 1, kind: input, shape index: {}]   ;;  %s1399_s2 = inlined_call_operand.vmem [shape: f32[32,1], index: 2, kind: input, shape index: {}]   ;;  %s1400_s3 = inlined_call_operand.vmem [shape: f32[32,32], index: 3, kind: input, shape index: {}]   ;;  %s1401_s4 = inlined_call_operand.vmem [shape: f32[32,1], index: 4, kind: input, shape index: {}]   ;;  %s1402_s5 = inlined_call_operand.vmem [shape: f32[4,32], index: 5, kind: input, shape index: {}]   ;;  %s1403_s6 = inlined_call_operand.vmem [shape: f32[4,1], index: 6, kind: input, shape index: {}]   ;;  %s1404_s7 = inlined_call_operand.hbm [shape: f32[6,512], index: 7, kind: output, shape index: {}]  }
   0x1   :  { %v27_v0 = vld [vmem:[%s1397_s0] sm:$0xff]  ;;  %v59_v3 = vunpack.c.l.s4 %v1109_v2  ;;  %160 = vmatprep.mubr.f32.mxu0 %v1110_v4  ;;  %249 = vmatprep.mubr.f32.mxu1 %v1110_v4  ;;  %v35_v7 = vld [vmem:[%s1399_s2 + $0x18] sm:$0xff]  ;;  %v33_v8 = vld [vmem:[%s1399_s2 + $0x8] sm:$0xff] }
   0x2   :  { %v62_v5 = vshrl.u32 %v61_v1, 7  ;;  %957 = vset.pattern.permute.xlu1 %v1111_v6  ;;  %956 = vset.pattern.permute.xlu0 %v1111_v6  ;;  %v57_v10 = vcombine.high %v27_v0, %v27_v0  ;;  %v34_v11 = vld [vmem:[%s1399_s2 + $0x10] sm:$0xff]  ;;  %v32_v12 = vld [vmem:[%s1399_s2] sm:$0xff] }
   0x3   :  { %v60_v9 = vunpack.c.0.s8 %v59_v3  ;;  %53 = vperm.xlu0 %956, %v35_v7   ;;  %43 = vperm.xlu1 %957, %v33_v8  }
   0x5   :  { %v63_v13 = vsub.s32 %v60_v9, %v62_v5 }
   0x6   :  { %12 = vsyncpa [#allocation3], 0  ;;  %vm87_vm0 = vcmask 1041408   ;;  %v28_v18 = vld [vmem:[%s1398_s1] sm:$0xff]  ;;  %vm74_vm1 = vcmask 15360   ;;  %v393_v19 = vld [vmem:[%s1401_s4 + $0x18] sm:$0xff] }
   0x7   :  { %v1170_v14 = vrot.slane %v27_v0, %v63_v13  ;;  %v1172_v15 = vrot.slane %v57_v10, %v63_v13  ;;  %48 = vperm.xlu0 %956, %v34_v11   ;;  %38 = vperm.xlu1 %957, %v32_v12   ;;  %v392_v20 = vld [vmem:[%s1401_s4 + $0x10] sm:$0xff]  ;;  %v29_v21 = vld [vmem:[%s1398_s1 + $0x8] sm:$0xff]  ;;  %v390_v23 = vld [vmem:[%s1401_s4] sm:$0xff]  ;;  %vm414_vm2 = vcmask 261120   ;;  %vm875_vm3 = vcmask 1043456  }
   0x8   :  { %v391_v22 = vld [vmem:[%s1401_s4 + $0x8] sm:$0xff]  ;;  %v30_v24 = vld [vmem:[%s1398_s1 + $0x10] sm:$0xff]  ;;  %v718_v25 = vld [vmem:[%s1403_s6] sm:$0xf] }
   0x9   :  { %v72_v16 = vcombine.high %v1170_v14, %v1170_v14  ;;  %v73_v17 = vcombine.high %v1172_v15, %v1172_v15  ;;  %v31_v26 = vld [vmem:[%s1398_s1 + $0x18] sm:$0xff] }
   0xb   :  { %898 = vmatprep.subr.msk.mxu0 %vm87_vm0, %v72_v16  ;;  %904 = vmatprep.subr.msk.mxu1 %vm87_vm0, %v73_v17 }
   0xc   :  { %899 = vmatpush1.msk.msra.mxu0 %vm87_vm0, %v1170_v14  ;;  %905 = vmatpush1.msk.msra.mxu1 %vm87_vm0, %v1172_v15 }
   0xd   :  { %900 = vmatmul.mubr.msk.f32.vlgmr.msra.gmra.mxu0 %vm74_vm1, %v28_v18  ;;  %906 = vmatmul.mubr.msk.f32.vlgmr.msra.gmra.mxu1 %vm74_vm1, %v28_v18 }
   0xe   :  { %166 = vmatprep.mubr.f32.mxu0 %v1110_v4  ;;  %255 = vmatprep.mubr.f32.mxu1 %v1110_v4 }
   0xf   :  { %411 = vperm.xlu0 %956, %v393_v19   ;;  %406 = vperm.xlu1 %957, %v392_v20  }
  0x11   :  { %901 = vmatmul.mubr.msk.f32.gmra.mxu0 %vm74_vm1, %v29_v21  ;;  %907 = vmatmul.mubr.msk.f32.gmra.mxu1 %vm74_vm1, %v29_v21 }
  0x12   :  { %172 = vmatprep.mubr.f32.mxu0 %v1110_v4  ;;  %261 = vmatprep.mubr.f32.mxu1 %v1110_v4 }
  0x13   :  { %401 = vperm.xlu0 %956, %v391_v22   ;;  %396 = vperm.xlu1 %957, %v390_v23  }
  0x15   :  { %902 = vmatmul.mubr.msk.f32.gmra.mxu0 %vm74_vm1, %v30_v24  ;;  %908 = vmatmul.mubr.msk.f32.gmra.mxu1 %vm74_vm1, %v30_v24 }
  0x16   :  { %178 = vmatprep.mubr.f32.mxu0 %v1110_v4  ;;  %267 = vmatprep.mubr.f32.mxu1 %v1110_v4 }
  0x17   :  { %721 = vperm.xlu0 %956, %v718_v25  }
  0x19   :  { %903 = vmatmul.mubr.msk.f32.gmra.mxu0 %vm74_vm1, %v31_v26  ;;  %909 = vmatmul.mubr.msk.f32.gmra.mxu1 %vm74_vm1, %v31_v26 }
  0x1a   :  { %491 = vmatprep.mubr.f32.mxu0 %v1110_v4  ;;  %580 = vmatprep.mubr.f32.mxu1 %v1110_v4 }
  0x7e   :  { %v44_v27 = vpop.permute.xlu1 %43  ;;  %v54_v31 = vpop.permute.xlu0 %53 }
  0x82   :  { %v39_v28 = vpop.permute.xlu1 %38  ;;  %v49_v46 = vpop.permute.xlu0 %48 }
  0xcd   :  { %v162_v29 = vpop.f32.mrf.mxu0  ;;  %v251_v30 = vpop.f32.mrf.mxu1 }
  0xce   :  { %v1223_v32 = vadd.f32 %v162_v29, %v39_v28  ;;  %v1253_v62 = vadd.f32 %v251_v30, %v39_v28 }
  0xcf   :  { %v164_v33 = vpop.f32.mrf.mxu0  ;;  %v253_v34 = vpop.f32.mrf.mxu1 }
  0xd0   :  { %v910_v35 = vmul.f32 -1.442695, %v1223_v32  ;;  %v1226_v36 = vadd.f32 %v164_v33, %v39_v28  ;;  %v1228_v37 = vadd.f32 %v253_v34, %v39_v28  ;;  %v912_v13 = vmul.f32 -1.442695, %v1253_v62 }
  0xd1   :  { %v168_v38 = vpop.f32.mrf.mxu0  ;;  %v257_v39 = vpop.f32.mrf.mxu1 }
  0xd2   :  { %v911_v40 = vmul.f32 -1.442695, %v1226_v36  ;;  %v913_v41 = vmul.f32 -1.442695, %v1228_v37  ;;  %v1232_v42 = vadd.f32 %v168_v38, %v44_v27  ;;  %959 = vpow2.f32 %v910_v35 }
  0xd3   :  { %v1234_v43 = vadd.f32 %v257_v39, %v44_v27  ;;  %v170_v44 = vpop.f32.mrf.mxu0  ;;  %v259_v45 = vpop.f32.mrf.mxu1 }
  0xd4   :  { %961 = vpow2.f32 %v911_v40  ;;  %v914_v47 = vmul.f32 -1.442695, %v1232_v42  ;;  %v1237_v48 = vadd.f32 %v170_v44, %v44_v27  ;;  %v1239_v49 = vadd.f32 %v259_v45, %v44_v27 }
  0xd5   :  { %963 = vpow2.f32 %v913_v41  ;;  %v916_v50 = vmul.f32 -1.442695, %v1234_v43  ;;  %v174_v51 = vpop.f32.mrf.mxu0  ;;  %v263_v52 = vpop.f32.mrf.mxu1 }
  0xd6   :  { %965 = vpow2.f32 %v914_v47  ;;  %v915_v53 = vmul.f32 -1.442695, %v1237_v48  ;;  %v917_v54 = vmul.f32 -1.442695, %v1239_v49  ;;  %v1244_v55 = vadd.f32 %v174_v51, %v49_v46 }
  0xd7   :  { %967 = vpow2.f32 %v916_v50  ;;  %v1246_v56 = vadd.f32 %v263_v52, %v49_v46  ;;  %v176_v57 = vpop.f32.mrf.mxu0  ;;  %v265_v58 = vpop.f32.mrf.mxu1 }
  0xd8   :  { %969 = vpow2.f32 %v915_v53  ;;  %v918_v59 = vmul.f32 -1.442695, %v1244_v55  ;;  %v1249_v60 = vadd.f32 %v176_v57, %v49_v46  ;;  %v1251_v61 = vadd.f32 %v265_v58, %v49_v46 }
  0xd9   :  { %971 = vpow2.f32 %v917_v54  ;;  %v920_v63 = vmul.f32 -1.442695, %v1246_v56  ;;  %v180_v0 = vpop.f32.mrf.mxu0  ;;  %v269_v1 = vpop.f32.mrf.mxu1 }
  0xda   :  { %973 = vpow2.f32 %v918_v59  ;;  %v919_v2 = vmul.f32 -1.442695, %v1249_v60  ;;  %v921_v3 = vmul.f32 -1.442695, %v1251_v61  ;;  %v1258_v5 = vadd.f32 %v180_v0, %v54_v31 }
  0xdb   :  { %975 = vpow2.f32 %v920_v63  ;;  %v1260_v6 = vadd.f32 %v269_v1, %v54_v31  ;;  %v182_v7 = vpop.f32.mrf.mxu0  ;;  %v271_v8 = vpop.f32.mrf.mxu1 }
  0xdc   :  { %977 = vpow2.f32 %v919_v2  ;;  %v922_v9 = vmul.f32 -1.442695, %v1258_v5  ;;  %v1263_v10 = vadd.f32 %v182_v7, %v54_v31  ;;  %v1265_v11 = vadd.f32 %v271_v8, %v54_v31 }
  0xdd   :  { %979 = vpow2.f32 %v921_v3  ;;  %v924_v12 = vmul.f32 -1.442695, %v1260_v6 }
  0xde   :  { %981 = vpow2.f32 %v922_v9  ;;  %v923_v16 = vmul.f32 -1.442695, %v1263_v10  ;;  %v925_v17 = vmul.f32 -1.442695, %v1265_v11 }
  0xdf   :  { %983 = vpow2.f32 %v924_v12  ;;  %v960_v18 = vpop.eup %959 }
  0xe0   :  { %985 = vpow2.f32 %v923_v16  ;;  %v322_v22 = vadd.f32 1.0, %v960_v18 }
  0xe1   :  { %v962_v19 = vpop.eup %961  ;;  %987 = vpow2.f32 %v925_v17 }
  0xe2   :  { %v964_v20 = vpop.eup %963  ;;  %989 = vpow2.f32 %v912_v13  ;;  %v323_v24 = vadd.f32 1.0, %v962_v19 }
  0xe3   :  { %v966_v21 = vpop.eup %965  ;;  %991 = vrcp.f32 %v322_v22  ;;  %v325_v57 = vadd.f32 1.0, %v964_v20 }
  0xe4   :  { %v968_v23 = vpop.eup %967  ;;  %v326_v26 = vadd.f32 1.0, %v966_v21  ;;  %993 = vrcp.f32 %v323_v24 }
  0xe5   :  { %v970_v25 = vpop.eup %969  ;;  %v328_v54 = vadd.f32 1.0, %v968_v23 }
  0xe6   :  { %v972_v27 = vpop.eup %971  ;;  %v327_v28 = vadd.f32 1.0, %v970_v25  ;;  %995 = vrcp.f32 %v326_v26 }
  0xe7   :  { %v974_v29 = vpop.eup %973  ;;  %v329_v52 = vadd.f32 1.0, %v972_v27 }
  0xe8   :  { %v976_v30 = vpop.eup %975  ;;  %v330_v31 = vadd.f32 1.0, %v974_v29  ;;  %997 = vrcp.f32 %v327_v28 }
  0xe9   :  { %v978_v33 = vpop.eup %977  ;;  %v332_v47 = vadd.f32 1.0, %v976_v30 }
  0xea   :  { %v980_v34 = vpop.eup %979  ;;  %v331_v35 = vadd.f32 1.0, %v978_v33  ;;  %999 = vrcp.f32 %v330_v31 }
  0xeb   :  { %v982_v38 = vpop.eup %981  ;;  %v333_v39 = vadd.f32 1.0, %v980_v34 }
  0xec   :  { %v984_v40 = vpop.eup %983  ;;  %1001 = vrcp.f32 %v331_v35  ;;  %v334_v41 = vadd.f32 1.0, %v982_v38 }
  0xed   :  { %v986_v44 = vpop.eup %985  ;;  %1003 = vrcp.f32 %v333_v39  ;;  %v336_v45 = vadd.f32 1.0, %v984_v40 }
  0xee   :  { %v988_v46 = vpop.eup %987  ;;  %1005 = vrcp.f32 %v334_v41  ;;  %v335_v50 = vadd.f32 1.0, %v986_v44 }
  0xef   :  { %v990_v51 = vpop.eup %989  ;;  %1007 = vrcp.f32 %v336_v45  ;;  %v337_v53 = vadd.f32 1.0, %v988_v46 }
  0xf0   :  { %1009 = vrcp.f32 %v335_v50  ;;  %v324_v58 = vadd.f32 1.0, %v990_v51  ;;  %v992_v59 = vpop.eup %991 }
  0xf1   :  { %1011 = vrcp.f32 %v337_v53  ;;  %v994_v63 = vpop.eup %993  ;;  %v370_v27 = vmul.f32 %v992_v59, %v1223_v32  ;;  %v387_v32 = vld [vmem:[%s1400_s3 + $0x8] sm:$0xff] }
  0xf2   :  { %1013 = vrcp.f32 %v332_v47 }
  0xf3   :  { %1015 = vrcp.f32 %v329_v52  ;;  %v996_v0 = vpop.eup %995 }
  0xf4   :  { %1017 = vrcp.f32 %v328_v54 }
  0xf5   :  { %1019 = vrcp.f32 %v325_v57  ;;  %v998_v1 = vpop.eup %997 }
  0xf6   :  { %1021 = vrcp.f32 %v324_v58 }
  0xf7   :  { %v1000_v2 = vpop.eup %999 }
  0xf8   :  { %v378_v24 = vmul.f32 %v1000_v2, %v1244_v55  ;;  %v371_v55 = vmul.f32 %v994_v63, %v1226_v36  ;;  %v388_v36 = vld [vmem:[%s1400_s3 + $0x10] sm:$0xff] }
  0xf9   :  { %v1002_v3 = vpop.eup %1001 }
  0xfa   :  { %v1004_v7 = vpop.eup %1003  ;;  %v379_v21 = vmul.f32 %v1002_v3, %v1249_v60  ;;  %v374_v60 = vmul.f32 %v996_v0, %v1232_v42  ;;  %v386_v42 = vld [vmem:[%s1400_s3] sm:$0xff] }
  0xfb   :  { %v1006_v8 = vpop.eup %1005  ;;  %v381_v25 = vmul.f32 %v1004_v7, %v1251_v61 }
  0xfc   :  { %v1008_v9 = vpop.eup %1007  ;;  %v382_v18 = vmul.f32 %v1006_v8, %v1258_v5 }
  0xfd   :  { %v1010_v12 = vpop.eup %1009  ;;  %v384_v22 = vmul.f32 %v1008_v9, %v1260_v6 }
  0xfe   :  { %v1012_v13 = vpop.eup %1011  ;;  %v383_v16 = vmul.f32 %v1010_v12, %v1263_v10  ;;  %v375_v10 = vmul.f32 %v998_v1, %v1237_v48 }
  0xff   :  { %v1014_v17 = vpop.eup %1013  ;;  %v385_v19 = vmul.f32 %v1012_v13, %v1265_v11 }
 0x100   :  { %v1016_v20 = vpop.eup %1015  ;;  %451 = vmatprep.subr.mxu0 %v383_v16  ;;  %v380_v5 = vmul.f32 %v1014_v17, %v1246_v56  ;;  %v412_v56 = vpop.permute.xlu0 %411 }
 0x101   :  { %v1018_v23 = vpop.eup %1017  ;;  %540 = vmatprep.subr.mxu1 %v385_v19  ;;  %452 = vmatpush1.msra.mxu0 %v382_v18  ;;  %v377_v6 = vmul.f32 %v1016_v20, %v1239_v49 }
 0x102   :  { %v1020_v26 = vpop.eup %1019  ;;  %541 = vmatpush1.msra.mxu1 %v384_v22  ;;  %453 = vmatprep.subr.mxu0 %v379_v21  ;;  %v376_v61 = vmul.f32 %v1018_v23, %v1234_v43  ;;  %v407_v43 = vpop.permute.xlu1 %406 }
 0x103   :  { %v1022_v11 = vpop.eup %1021  ;;  %542 = vmatprep.subr.mxu1 %v381_v25  ;;  %454 = vmatpush1.msra.mxu0 %v378_v24  ;;  %v373_v48 = vmul.f32 %v1020_v26, %v1228_v37  ;;  %v389_v37 = vld [vmem:[%s1400_s3 + $0x18] sm:$0xff] }
 0x104   :  { %543 = vmatpush1.msra.mxu1 %v380_v5  ;;  %455 = vmatprep.subr.mxu0 %v375_v10  ;;  %v372_v49 = vmul.f32 %v1022_v11, %v1253_v62  ;;  %v402_v38 = vpop.permute.xlu0 %401 }
 0x105   :  { %544 = vmatprep.subr.mxu1 %v377_v6  ;;  %456 = vmatpush1.msra.mxu0 %v374_v60 }
 0x106   :  { %545 = vmatpush1.msra.mxu1 %v376_v61  ;;  %457 = vmatprep.subr.mxu0 %v371_v55  ;;  %v397_v62 = vpop.permute.xlu1 %396 }
 0x107   :  { %546 = vmatprep.subr.mxu1 %v373_v48  ;;  %458 = vmatpush1.msra.mxu0 %v370_v27 }
 0x108   :  { %547 = vmatpush1.msra.mxu1 %v372_v49  ;;  %926 = vmatmul.mubr.msk.f32.vlgmr.msra.gmra.mxu0 %vm414_vm2, %v386_v42 }
 0x109   :  { %930 = vmatmul.mubr.msk.f32.vlgmr.msra.gmra.mxu1 %vm414_vm2, %v386_v42  ;;  %497 = vmatprep.mubr.f32.mxu0 %v1110_v4 }
 0x10a   :  { %586 = vmatprep.mubr.f32.mxu1 %v1110_v4 }
 0x10c   :  { %927 = vmatmul.mubr.msk.f32.gmra.mxu0 %vm414_vm2, %v387_v32 }
 0x10d   :  { %931 = vmatmul.mubr.msk.f32.gmra.mxu1 %vm414_vm2, %v387_v32  ;;  %503 = vmatprep.mubr.f32.mxu0 %v1110_v4 }
 0x10e   :  { %592 = vmatprep.mubr.f32.mxu1 %v1110_v4 }
 0x110   :  { %928 = vmatmul.mubr.msk.f32.gmra.mxu0 %vm414_vm2, %v388_v36 }
 0x111   :  { %932 = vmatmul.mubr.msk.f32.gmra.mxu1 %vm414_vm2, %v388_v36  ;;  %509 = vmatprep.mubr.f32.mxu0 %v1110_v4 }
 0x112   :  { %598 = vmatprep.mubr.f32.mxu1 %v1110_v4 }
 0x114   :  { %929 = vmatmul.mubr.msk.f32.gmra.mxu0 %vm414_vm2, %v389_v37 }
 0x115   :  { %933 = vmatmul.mubr.msk.f32.gmra.mxu1 %vm414_vm2, %v389_v37  ;;  %791 = vmatprep.mubr.f32.mxu0 %v1110_v4 }
 0x116   :  { %862 = vmatprep.mubr.f32.mxu1 %v1110_v4 }
 0x1c8   :  { %v493_v28 = vpop.f32.mrf.mxu0 }
 0x1c9   :  { %v1315_v29 = vadd.f32 %v493_v28, %v397_v62  ;;  %v582_v30 = vpop.f32.mrf.mxu1 }
 0x1ca   :  { %v495_v31 = vpop.f32.mrf.mxu0  ;;  %v1346_v16 = vadd.f32 %v582_v30, %v397_v62 }
 0x1cb   :  { %v934_v33 = vmul.f32 -1.442695, %v1315_v29  ;;  %v1318_v34 = vadd.f32 %v495_v31, %v397_v62  ;;  %v584_v35 = vpop.f32.mrf.mxu1 }
 0x1cc   :  { %v1320_v39 = vadd.f32 %v584_v35, %v397_v62  ;;  %v499_v40 = vpop.f32.mrf.mxu0  ;;  %v936_v5 = vmul.f32 -1.442695, %v1346_v16 }
 0x1cd   :  { %v935_v41 = vmul.f32 -1.442695, %v1318_v34  ;;  %v1323_v4 = vadd.f32 %v499_v40, %v402_v38  ;;  %v588_v44 = vpop.f32.mrf.mxu1  ;;  %1023 = vpow2.f32 %v934_v33 }
 0x1ce   :  { %v937_v45 = vmul.f32 -1.442695, %v1320_v39  ;;  %v1326_v46 = vadd.f32 %v588_v44, %v402_v38  ;;  %v501_v47 = vpop.f32.mrf.mxu0 }
 0x1cf   :  { %1025 = vpow2.f32 %v935_v41  ;;  %v938_v50 = vmul.f32 -1.442695, %v1323_v4  ;;  %v1329_v51 = vadd.f32 %v501_v47, %v402_v38  ;;  %v590_v52 = vpop.f32.mrf.mxu1 }
 0x1d0   :  { %1027 = vpow2.f32 %v937_v45  ;;  %v940_v53 = vmul.f32 -1.442695, %v1326_v46  ;;  %v1332_v54 = vadd.f32 %v590_v52, %v402_v38  ;;  %v505_v57 = vpop.f32.mrf.mxu0 }
 0x1d1   :  { %1029 = vpow2.f32 %v938_v50  ;;  %v939_v58 = vmul.f32 -1.442695, %v1329_v51  ;;  %v1335_v59 = vadd.f32 %v505_v57, %v407_v43  ;;  %v594_v63 = vpop.f32.mrf.mxu1 }
 0x1d2   :  { %1031 = vpow2.f32 %v940_v53  ;;  %v941_v0 = vmul.f32 -1.442695, %v1332_v54  ;;  %v1338_v1 = vadd.f32 %v594_v63, %v407_v43  ;;  %v507_v2 = vpop.f32.mrf.mxu0 }
 0x1d3   :  { %1033 = vpow2.f32 %v939_v58  ;;  %v942_v3 = vmul.f32 -1.442695, %v1335_v59  ;;  %v1341_v7 = vadd.f32 %v507_v2, %v407_v43  ;;  %v596_v8 = vpop.f32.mrf.mxu1 }
 0x1d4   :  { %1035 = vpow2.f32 %v941_v0  ;;  %v944_v9 = vmul.f32 -1.442695, %v1338_v1  ;;  %v1344_v12 = vadd.f32 %v596_v8, %v407_v43  ;;  %v511_v13 = vpop.f32.mrf.mxu0 }
 0x1d5   :  { %1037 = vpow2.f32 %v942_v3  ;;  %v943_v17 = vmul.f32 -1.442695, %v1341_v7  ;;  %v1349_v18 = vadd.f32 %v511_v13, %v412_v56  ;;  %v600_v19 = vpop.f32.mrf.mxu1 }
 0x1d6   :  { %1039 = vpow2.f32 %v944_v9  ;;  %v945_v20 = vmul.f32 -1.442695, %v1344_v12  ;;  %v1352_v21 = vadd.f32 %v600_v19, %v412_v56  ;;  %v513_v22 = vpop.f32.mrf.mxu0 }
 0x1d7   :  { %1041 = vpow2.f32 %v943_v17  ;;  %v946_v23 = vmul.f32 -1.442695, %v1349_v18  ;;  %v1355_v24 = vadd.f32 %v513_v22, %v412_v56  ;;  %v602_v25 = vpop.f32.mrf.mxu1 }
 0x1d8   :  { %1043 = vpow2.f32 %v945_v20  ;;  %v948_v26 = vmul.f32 -1.442695, %v1352_v21  ;;  %v1358_v10 = vadd.f32 %v602_v25, %v412_v56 }
 0x1d9   :  { %1045 = vpow2.f32 %v946_v23  ;;  %v947_v11 = vmul.f32 -1.442695, %v1355_v24 }
 0x1da   :  { %1047 = vpow2.f32 %v948_v26  ;;  %v949_v60 = vmul.f32 -1.442695, %v1358_v10  ;;  %v1024_v6 = vpop.eup %1023 }
 0x1db   :  { %1049 = vpow2.f32 %v947_v11  ;;  %v653_v48 = vadd.f32 1.0, %v1024_v6 }
 0x1dc   :  { %v1026_v55 = vpop.eup %1025  ;;  %1051 = vpow2.f32 %v949_v60 }
 0x1dd   :  { %v1028_v61 = vpop.eup %1027  ;;  %1053 = vpow2.f32 %v936_v5  ;;  %v654_v49 = vadd.f32 1.0, %v1026_v55 }
 0x1de   :  { %v1030_v27 = vpop.eup %1029  ;;  %1055 = vrcp.f32 %v653_v48  ;;  %v656_v0 = vadd.f32 1.0, %v1028_v61 }
 0x1df   :  { %v1032_v42 = vpop.eup %1031  ;;  %v657_v36 = vadd.f32 1.0, %v1030_v27  ;;  %1057 = vrcp.f32 %v654_v49 }
 0x1e0   :  { %v1034_v32 = vpop.eup %1033  ;;  %v659_v63 = vadd.f32 1.0, %v1032_v42 }
 0x1e1   :  { %v1036_v37 = vpop.eup %1035  ;;  %v658_v43 = vadd.f32 1.0, %v1034_v32  ;;  %1059 = vrcp.f32 %v657_v36 }
 0x1e2   :  { %v1038_v56 = vpop.eup %1037  ;;  %v660_v57 = vadd.f32 1.0, %v1036_v37 }
 0x1e3   :  { %v1040_v62 = vpop.eup %1039  ;;  %v661_v28 = vadd.f32 1.0, %v1038_v56  ;;  %1061 = vrcp.f32 %v658_v43 }
 0x1e4   :  { %v1042_v30 = vpop.eup %1041  ;;  %v663_v50 = vadd.f32 1.0, %v1040_v62 }
 0x1e5   :  { %v1044_v31 = vpop.eup %1043  ;;  %v662_v33 = vadd.f32 1.0, %v1042_v30  ;;  %1063 = vrcp.f32 %v661_v28 }
 0x1e6   :  { %v1046_v35 = vpop.eup %1045  ;;  %v664_v38 = vadd.f32 1.0, %v1044_v31 }
 0x1e7   :  { %v1048_v40 = vpop.eup %1047  ;;  %1065 = vrcp.f32 %v662_v33  ;;  %v665_v41 = vadd.f32 1.0, %v1046_v35 }
 0x1e8   :  { %v1050_v44 = vpop.eup %1049  ;;  %1067 = vrcp.f32 %v664_v38  ;;  %v667_v45 = vadd.f32 1.0, %v1048_v40 }
 0x1e9   :  { %v1052_v47 = vpop.eup %1051  ;;  %1069 = vrcp.f32 %v665_v41  ;;  %v666_v52 = vadd.f32 1.0, %v1050_v44 }
 0x1ea   :  { %v1054_v53 = vpop.eup %1053  ;;  %1071 = vrcp.f32 %v667_v45  ;;  %v668_v58 = vadd.f32 1.0, %v1052_v47 }
 0x1eb   :  { %1073 = vrcp.f32 %v666_v52  ;;  %v655_v2 = vadd.f32 1.0, %v1054_v53  ;;  %v1056_v3 = vpop.eup %1055 }
 0x1ec   :  { %1075 = vrcp.f32 %v668_v58  ;;  %v1058_v8 = vpop.eup %1057  ;;  %v701_v36 = vmul.f32 %v1056_v3, %v1315_v29  ;;  %v869_v29 = vcombine.low %v1170_v14, %v1170_v14 }
 0x1ed   :  { %1077 = vrcp.f32 %v663_v50 }
 0x1ee   :  { %1079 = vrcp.f32 %v660_v57  ;;  %v1060_v9 = vpop.eup %1059 }
 0x1ef   :  { %1081 = vrcp.f32 %v659_v63 }
 0x1f0   :  { %1083 = vrcp.f32 %v656_v0  ;;  %v1062_v13 = vpop.eup %1061 }
 0x1f1   :  { %1085 = vrcp.f32 %v655_v2 }
 0x1f2   :  { %v1064_v17 = vpop.eup %1063 }
 0x1f3   :  { %v709_v42 = vmul.f32 %v1064_v17, %v1335_v59  ;;  %v702_v59 = vmul.f32 %v1058_v8, %v1318_v34  ;;  %v722_v34 = vpop.permute.xlu0 %721 }
 0x1f4   :  { %v1066_v19 = vpop.eup %1065 }
 0x1f5   :  { %v1068_v20 = vpop.eup %1067  ;;  %v710_v61 = vmul.f32 %v1066_v19, %v1341_v7  ;;  %v705_v7 = vmul.f32 %v1060_v9, %v1323_v4  ;;  %v717_v4 = vld [vmem:[%s1402_s5] sm:$0xf]  ;;  %s1112_s5 = smov [#allocation2]  }
 0x1f6   :  { %v1070_v22 = vpop.eup %1069  ;;  %v712_v49 = vmul.f32 %v1068_v20, %v1344_v12  ;;  %s890_s9 = sshll.u32 %s1112_s5, 4  ;;  %s891_s9 = int_to_ptr.vmem [resolvable:$true] %s890_s9 }
 0x1f7   :  { %v1072_v23 = vpop.eup %1071  ;;  %v713_v60 = vmul.f32 %v1070_v22, %v1349_v18  ;;  %s1087_s10 = scalar_lea.vmem %s891_s9, 512  ;;  %p1092_p1 = scmp.lt.s32.totalorder %s891_s9, %s891_s9 }
 0x1f8   :  { %v1074_v25 = vpop.eup %1073  ;;  %v715_v27 = vmul.f32 %v1072_v23, %v1352_v21  ;;  %p1088_p0 = scmp.ne.s32.totalorder %s891_s9, %s1087_s10  ;;  %p1093_p2 = scmp.lt.s32.totalorder %s1087_s10, %s1087_s10 }
 0x1f9   :  { %v1076_v26 = vpop.eup %1075  ;;  %v714_v5 = vmul.f32 %v1074_v25, %v1355_v24  ;;  %v706_v24 = vmul.f32 %v1062_v13, %v1329_v51 }
 0x1fa   :  { %v1078_v11 = vpop.eup %1077  ;;  %v716_v6 = vmul.f32 %v1076_v26, %v1358_v10  ;;  %p1094_p3 = por %p1093_p2, %p1092_p1 }
 0x1fb   :  { %v1080_v55 = vpop.eup %1079  ;;  %751 = vmatprep.subr.mxu0 %v714_v5  ;;  %v711_v18 = vmul.f32 %v1078_v11, %v1338_v1 }
 0x1fc   :  { %v1082_v48 = vpop.eup %1081  ;;  %822 = vmatprep.subr.mxu1 %v716_v6  ;;  %752 = vmatpush1.msra.mxu0 %v713_v60  ;;  %v708_v21 = vmul.f32 %v1080_v55, %v1332_v54  ;;  %p1095_p4 = pnand %p1094_p3, %p1088_p0 }
 0x1fd   :  { %v1084_v32 = vpop.eup %1083  ;;  %823 = vmatpush1.msra.mxu1 %v715_v27  ;;  %753 = vmatprep.subr.mxu0 %v710_v61  ;;  %v707_v12 = vmul.f32 %v1082_v48, %v1326_v46  ;;  %v870_v46 = vcombine.low %v1172_v15, %v1172_v15 }
 0x1fe   :  { %v1086_v10 = vpop.eup %1085  ;;  %824 = vmatprep.subr.mxu1 %v712_v49  ;;  %754 = vmatpush1.msra.mxu0 %v709_v42  ;;  %v704_v51 = vmul.f32 %v1084_v32, %v1320_v39 }
 0x1ff   :  { %825 = vmatpush1.msra.mxu1 %v711_v18  ;;  %755 = vmatprep.subr.mxu0 %v706_v24  ;;  %v703_v54 = vmul.f32 %v1086_v10, %v1346_v16 }
 0x200   :  { %826 = vmatprep.subr.mxu1 %v708_v21  ;;  %756 = vmatpush1.msra.mxu0 %v705_v7 }
 0x201   :  { %827 = vmatpush1.msra.mxu1 %v707_v12  ;;  %757 = vmatprep.subr.mxu0 %v702_v59 }
 0x202   :  { %828 = vmatprep.subr.mxu1 %v704_v51  ;;  %758 = vmatpush1.msra.mxu0 %v701_v36 }
 0x203   :  { %829 = vmatpush1.msra.mxu1 %v703_v54  ;;  %950 = vmatmul.mubr.msk.f32.vlgmr.msra.gmra.mxu0 %vm414_vm2, %v717_v4 }
 0x204   :  { %951 = vmatmul.mubr.msk.f32.vlgmr.msra.gmra.mxu1 %vm414_vm2, %v717_v4 }
 0x2c3   :  { %v793_v39 = vpop.f32.mrf.mxu0 }
 0x2c4   :  { %v794_v1 = vadd.f32 %v793_v39, %v722_v34  ;;  %v864_v16 = vpop.f32.mrf.mxu1 }
 0x2c5   :  { %v865_v37 = vadd.f32 %v864_v16, %v722_v34  ;;  %v795_v43 = vpop.f32.mrf.mxu0 }
 0x2c6   :  { %v876_v56 = vsel %vm875_vm3, %v794_v1, %v869_v29  ;;  %v796_v62 = vadd.f32 %v795_v43, %v722_v34  ;;  %v866_v28 = vpop.f32.mrf.mxu1 }
 0x2c7   :  { %880 = vst [vmem:[#allocation2] sm:$0x3f] %v876_v56  ;;  %v878_v30 = vsel %vm875_vm3, %v865_v37, %v870_v46  ;;  %v867_v31 = vadd.f32 %v866_v28, %v722_v34 }
 0x2c8   :  { %882 = vst [vmem:[#allocation2 + $0x10] sm:$0x3f] %v878_v30  ;;  %v877_v33 = vsel %vm875_vm3, %v796_v62, %v1170_v14 }
 0x2c9   :  { %881 = vst [vmem:[#allocation2 + $0x8] sm:$0x3f] %v877_v33  ;;  %v879_v35 = vsel %vm875_vm3, %v867_v31, %v1172_v15 }
 0x2ca   :  { %883 = vst [vmem:[#allocation2 + $0x18] sm:$0x3f] %v879_v35 }
 0x2cb   :  { %1098 = shalt.err (!%p1095_p4)
}
 0x2cc   :  { %893 = dma.vmem_to_hbm [thread:$0]  %s891_s9, 512, %s1404_s7, [#allocation3]  }
 0x2cd   :  { %1107 = dma.done.wait [#allocation3], 512  }
 0x2ce   :  { %1108 = vsyncadd [#allocation3], 4294966784 }
 0x2cf   :  { %897 = vsyncpa [#allocation3], 1 }

</bundles_post_ra>
